<compile_context>
chip_gen: v7x
topology: tpu7x:2x2x1
jax: 0.10.0
libtpu: 0.0.40
codegen_flags: <defaults>
</compile_context>

<pallas_src>
import functools

import jax
import jax.numpy as jnp
import numpy as np
from jax.experimental import pallas as pl
from jax.experimental.pallas import tpu as pltpu


# ----------------------------------------------------------------------------- kernels

def _deconv_matmul_kernel(x_ref, w_ref, b_ref, o_ref):
    # ConvTranspose3d with kernel_size == stride == 2 is a pure per-voxel matmul:
    #   out[(n,d,h,w), (kd,kh,kw,co)] = sum_ci x[(n,d,h,w), ci] * W[ci, co, kd,kh,kw] + b[co]
    # x: (TS, Cin), w: (Cin, 8*Cout), b: (1, 8*Cout)
    o_ref[...] = (
        jnp.dot(x_ref[...], w_ref[...], preferred_element_type=jnp.float32) + b_ref[...]
    ).astype(o_ref.dtype)


def _conv3_gn_relu_kernel(x_ref, w_ref, b_ref, g_ref, be_ref, o_ref, pad_ref, *,
                          D, H, W, Cin, Cout, G, eps):
    """One sample per grid step: Conv3d(k=3, p=1) + GroupNorm(G) + ReLU.

    x_ref  : (1, D, H, W, Cin) f32 input block
    w_ref  : (3, 9*Cin, Cout) bf16 weights; contraction axis ordered (kh, kw, ci)
    b_ref / g_ref / be_ref : (1, Cout) f32 conv bias / GN gamma / GN beta
    o_ref  : (1, D, H, W, Cout) output block
    pad_ref: VMEM scratch (D+2, H+2, W+2, Cin) bf16 (halo handled in-kernel, no HBM pad)
    """
    S = D * H * W

    # zero-padded copy of the sample in VMEM (border stays 0 -> conv "same" padding)
    pad_ref[...] = jnp.zeros_like(pad_ref)
    pad_ref[1:1 + D, 1:1 + H, 1:1 + W, :] = x_ref[0].astype(jnp.bfloat16)

    # im2col over (kh, kw): one lane-axis concat -> 3 wide-K matmuls (K = 9*Cin)
    pieces = [pad_ref[:, kh:kh + H, kw:kw + W, :] for kh in range(3) for kw in range(3)]
    x9 = jnp.concatenate(pieces, axis=-1)                 # (D+2, H, W, 9*Cin) bf16

    acc = jnp.zeros((S, Cout), jnp.float32)
    for kd in range(3):
        a = x9[kd:kd + D].reshape(S, 9 * Cin)             # lane dim unchanged (cheap)
        acc = acc + jnp.dot(a, w_ref[kd], preferred_element_type=jnp.float32)
    acc = acc + b_ref[...]                                # conv bias, f32

    # GroupNorm(num_groups=G): stats over (spatial, channels-in-group) per sample,
    # fully vectorized via a same-group 0/1 pooling matrix (MXU) + rsqrt (EUP).
    cpg = Cout // G
    row_g = jax.lax.broadcasted_iota(jnp.int32, (Cout, Cout), 0) // cpg
    col_g = jax.lax.broadcasted_iota(jnp.int32, (Cout, Cout), 1) // cpg
    pool = (row_g == col_g).astype(jnp.float32)           # (Cout, Cout)
    cnt = float(S * cpg)

    pooled = jnp.dot(acc, pool, preferred_element_type=jnp.float32)       # (S, Cout)
    mean_c = jnp.sum(pooled, axis=0, keepdims=True) / cnt                 # (1, Cout)
    dev = acc - mean_c
    pooled2 = jnp.dot(dev * dev, pool, preferred_element_type=jnp.float32)
    var_c = jnp.sum(pooled2, axis=0, keepdims=True) / cnt                 # biased, as torch
    inv_c = jax.lax.rsqrt(var_c + eps)

    y = jnp.maximum(dev * inv_c * g_ref[...] + be_ref[...], 0.0)          # affine + ReLU
    o_ref[...] = y.reshape(1, D, H, W, Cout).astype(o_ref.dtype)


# ----------------------------------------------------------------------------- wrappers

def _deconv2x(x, w, b):
    """ConvTranspose3d(k=2, s=2). x: (N,D,H,W,Cin); w: (Cin,Cout,2,2,2); b: (Cout,)."""
    N, D, H, W, Cin = x.shape
    Cout = w.shape[1]
    wm = jnp.transpose(w, (0, 2, 3, 4, 1)).reshape(Cin, 8 * Cout)   # (Cin, kd*kh*kw*Cout)
    bm = jnp.tile(b, 8).reshape(1, 8 * Cout)
    S = N * D * H * W
    xf = x.reshape(S, Cin)

    # Row-tiled, pipelined, parallel grid (was grid=(1,) whole-slab before).
    ts = min(1024, max(8, ((S + 1) // 2 + 7) // 8 * 8))
    grid = (pl.cdiv(S, ts),)

    yf = pl.pallas_call(
        _deconv_matmul_kernel,
        out_shape=jax.ShapeDtypeStruct((S, 8 * Cout), jnp.float32),
        grid=grid,
        in_specs=[
            pl.BlockSpec((ts, Cin), lambda i: (i, 0)),
            pl.BlockSpec((Cin, 8 * Cout), lambda i: (0, 0)),
            pl.BlockSpec((1, 8 * Cout), lambda i: (0, 0)),
        ],
        out_specs=pl.BlockSpec((ts, 8 * Cout), lambda i: (i, 0)),
        compiler_params=pltpu.CompilerParams(dimension_semantics=("parallel",)),
    )(xf, wm, bm)

    # scatter the 8 kernel offsets into the strided (2x) output positions
    # TODO(synk): fold this scatter into the conv1 kernel to save one HBM round trip.
    y = yf.reshape(N, D, H, W, 2, 2, 2, Cout)
    y = jnp.transpose(y, (0, 1, 4, 2, 5, 3, 6, 7)).reshape(N, 2 * D, 2 * H, 2 * W, Cout)
    return y


def _conv3_gn_relu(x, w, b, gamma, beta, *, num_groups=8, eps=1e-5):
    """LUConv: Conv3d(k=3,p=1) + GroupNorm(8) + ReLU. x: (N,D,H,W,Cin); w: (Cout,Cin,3,3,3)."""
    N, D, H, W, Cin = x.shape
    Cout = w.shape[0]
    # weights: (Cout,Cin,kd,kh,kw) -> (kd, (kh,kw,ci), co), bf16 operands for the MXU
    wm = jnp.transpose(w, (2, 3, 4, 1, 0)).reshape(3, 9 * Cin, Cout).astype(jnp.bfloat16)

    kernel = functools.partial(
        _conv3_gn_relu_kernel, D=D, H=H, W=W, Cin=Cin, Cout=Cout, G=num_groups, eps=eps
    )
    out = pl.pallas_call(
        kernel,
        out_shape=jax.ShapeDtypeStruct((N, D, H, W, Cout), jnp.float32),
        grid=(N,),
        in_specs=[
            pl.BlockSpec((1, D, H, W, Cin), lambda n: (n, 0, 0, 0, 0)),
            pl.BlockSpec((3, 9 * Cin, Cout), lambda n: (0, 0, 0)),
            pl.BlockSpec((1, Cout), lambda n: (0, 0)),
            pl.BlockSpec((1, Cout), lambda n: (0, 0)),
            pl.BlockSpec((1, Cout), lambda n: (0, 0)),
        ],
        out_specs=pl.BlockSpec((1, D, H, W, Cout), lambda n: (n, 0, 0, 0, 0)),
        scratch_shapes=[pltpu.VMEM((D + 2, H + 2, W + 2, Cin), jnp.bfloat16)],
        compiler_params=pltpu.CompilerParams(dimension_semantics=("parallel",)),
    )(x, wm, b.reshape(1, Cout), gamma.reshape(1, Cout), beta.reshape(1, Cout))
    return out


def up_transition_wo_skip(x_ncdhw, params):
    """Forward pass of UpTransition_wo_skip. Input/output are NCDHW (PyTorch convention)."""
    x = jnp.transpose(x_ncdhw, (0, 2, 3, 4, 1)).astype(jnp.float32)   # -> channels-last
    y = _deconv2x(x, params["up_w"], params["up_b"])                  # up_conv
    y = _conv3_gn_relu(y, params["c1_w"], params["c1_b"],
                       params["g1_w"], params["g1_b"])                # ops[0]
    y = _conv3_gn_relu(y, params["c2_w"], params["c2_b"],
                       params["g2_w"], params["g2_b"])                # ops[1]
    return jnp.transpose(y, (0, 4, 1, 2, 3))                          # -> NCDHW


# ----------------------------------------------------------------------------- params / reference

def init_params(key, inChans, outChans, depth):
    C = 32 * 2 ** (depth + 1)   # double_chnnel=True
    ks = jax.random.split(key, 10)

    def nrm(k, shape, scale):
        return (scale * jax.random.normal(k, shape)).astype(jnp.float32)

    return {
        "up_w": nrm(ks[0], (inChans, outChans, 2, 2, 2), 0.2),   # ConvTranspose3d weight
        "up_b": nrm(ks[1], (outChans,), 0.1),
        "c1_w": nrm(ks[2], (C, outChans, 3, 3, 3), 0.2),         # LUConv1 conv weight
        "c1_b": nrm(ks[3], (C,), 0.1),
        "g1_w": 1.0 + nrm(ks[4], (C,), 0.05),                    # GroupNorm affine
        "g1_b": nrm(ks[5], (C,), 0.05),
        "c2_w": nrm(ks[6], (C, C, 3, 3, 3), 0.05),               # LUConv2 conv weight
        "c2_b": nrm(ks[7], (C,), 0.1),
        "g2_w": 1.0 + nrm(ks[8], (C,), 0.05),
        "g2_b": nrm(ks[9], (C,), 0.05),
    }


def _gn_ref(x, gamma, beta, G=8, eps=1e-5):
    N, D, H, W, C = x.shape
    xg = x.reshape(N, D, H, W, G, C // G)
    mean = xg.mean(axis=(1, 2, 3, 5), keepdims=True)
    var = ((xg - mean) ** 2).mean(axis=(1, 2, 3, 5), keepdims=True)
    xn = ((xg - mean) / jnp.sqrt(var + eps)).reshape(N, D, H, W, C)
    return xn * gamma + beta


def _conv3_ref(x, w, b):
    wk = jnp.transpose(w, (2, 3, 4, 1, 0))  # DHWIO
    y = jax.lax.conv_general_dilated(
        x, wk, window_strides=(1, 1, 1), padding=((1, 1), (1, 1), (1, 1)),
        dimension_numbers=("NDHWC", "DHWIO", "NDHWC"),
        precision=jax.lax.Precision.HIGHEST)
    return y + b


def reference(x_ncdhw, params):
    x = jnp.transpose(x_ncdhw, (0, 2, 3, 4, 1))
    N, D, H, W, Cin = x.shape
    w, b = params["up_w"], params["up_b"]
    Cout = w.shape[1]
    t = jnp.einsum("ndhwi,iojkl->ndhwjklo", x, w)
    y = jnp.transpose(t, (0, 1, 4, 2, 5, 3, 6, 7)).reshape(N, 2 * D, 2 * H, 2 * W, Cout) + b
    y = jnp.maximum(_gn_ref(_conv3_ref(y, params["c1_w"], params["c1_b"]),
                            params["g1_w"], params["g1_b"]), 0.0)
    y = jnp.maximum(_gn_ref(_conv3_ref(y, params["c2_w"], params["c2_b"]),
                            params["g2_w"], params["g2_b"]), 0.0)
    return jnp.transpose(y, (0, 4, 1, 2, 3))


# ----------------------------------------------------------------------------- main

if __name__ == "__main__":
    inChans, outChans, depth = 8, 4, 0          # -> LUConv channels = 32 * 2**(depth+1) = 64
    N, D0 = 2, 4                                 # input spatial 4x4x4, upsampled to 8x8x8

    key = jax.random.PRNGKey(0)
    kx, kp = jax.random.split(key)
    x = jax.random.normal(kx, (N, inChans, D0, D0, D0), jnp.float32)
    params = init_params(kp, inChans, outChans, depth)

    out = up_transition_wo_skip(x, params)
    out = jax.block_until_ready(out)

    assert out.shape == (N, 32 * 2 ** (depth + 1), 2 * D0, 2 * D0, 2 * D0), out.shape
    assert bool(jnp.all(jnp.isfinite(out)))

    ref = jax.block_until_ready(reference(x, params))
    np.testing.assert_allclose(np.asarray(out), np.asarray(ref), rtol=2e-2, atol=2e-2)

    print("KERNEL_OK")
</pallas_src>

<mosaic_0001>
module attributes {stable_mosaic.version = 11 : i64} {
  func.func @_deconv_matmul_kernel(%arg0: i32, %arg1: memref<64x8xf32, #tpu.memory_space<vmem>>, %arg2: memref<8x32xf32, #tpu.memory_space<vmem>>, %arg3: memref<1x32xf32, #tpu.memory_space<vmem>>, %arg4: memref<64x32xf32, #tpu.memory_space<vmem>>) attributes {dimension_semantics = [#tpu.dimension_semantics<parallel>], iteration_bounds = array<i64: 2>, scalar_prefetch = 0 : i64, scratch_operands = 0 : i64, tpu.core_type = #tpu.core_type<tc>, window_params = [{transform_indices = @transform_0, window_bounds = array<i64: 64, 8>}, {pipeline_mode = #tpu.pipeline_mode<synchronous>, transform_indices = @transform_1, window_bounds = array<i64: 8, 32>}, {pipeline_mode = #tpu.pipeline_mode<synchronous>, transform_indices = @transform_2, window_bounds = array<i64: 1, 32>}, {transform_indices = @transform_3, window_bounds = array<i64: 64, 32>}]} {
    %c0 = arith.constant 0 : index
    %c0_0 = arith.constant 0 : index
    %0 = vector.load %arg1[%c0, %c0_0] : memref<64x8xf32, #tpu.memory_space<vmem>>, vector<64x8xf32>
    %c0_1 = arith.constant 0 : index
    %c0_2 = arith.constant 0 : index
    %1 = vector.load %arg2[%c0_1, %c0_2] : memref<8x32xf32, #tpu.memory_space<vmem>>, vector<8x32xf32>
    %cst = arith.constant dense<0.000000e+00> : vector<64x32xf32>
    %2 = tpu.matmul %0, %1, %cst {dimension_numbers = #tpu.dot_dimension_numbers<[1], [0], [0], [1], [0, 0, 1, 1], [], []>} : vector<64x8xf32>, vector<8x32xf32>, vector<64x32xf32> -> vector<64x32xf32>
    %c0_3 = arith.constant 0 : index
    %c0_4 = arith.constant 0 : index
    %3 = vector.load %arg3[%c0_3, %c0_4] : memref<1x32xf32, #tpu.memory_space<vmem>>, vector<1x32xf32>
    %4 = vector.broadcast %3 : vector<1x32xf32> to vector<64x32xf32>
    %5 = arith.addf %2, %4 : vector<64x32xf32>
    %c0_5 = arith.constant 0 : index
    %c0_6 = arith.constant 0 : index
    %6 = vector.load %arg4[%c0_5, %c0_6] : memref<64x32xf32, #tpu.memory_space<vmem>>, vector<64x32xf32>
    tpu.vector_store %arg4[%c0_5, %c0_6], %5 {strides = array<i32>} : memref<64x32xf32, #tpu.memory_space<vmem>>, vector<64x32xf32>,
    return
  }
  func.func @transform_0(%arg0: i32) -> (i32, i32) {
    %c0_i32 = arith.constant 0 : i32
    %c0_i32_0 = arith.constant 0 : i32
    return %arg0, %c0_i32 : i32, i32
  }
  func.func @transform_1(%arg0: i32) -> (i32, i32) {
    %c0_i32 = arith.constant 0 : i32
    %c0_i32_0 = arith.constant 0 : i32
    %c0_i32_1 = arith.constant 0 : i32
    return %c0_i32, %c0_i32_0 : i32, i32
  }
  func.func @transform_2(%arg0: i32) -> (i32, i32) {
    %c0_i32 = arith.constant 0 : i32
    %c0_i32_0 = arith.constant 0 : i32
    %c0_i32_1 = arith.constant 0 : i32
    return %c0_i32, %c0_i32_0 : i32, i32
  }
  func.func @transform_3(%arg0: i32) -> (i32, i32) {
    %c0_i32 = arith.constant 0 : i32
    %c0_i32_0 = arith.constant 0 : i32
    return %arg0, %c0_i32 : i32, i32
  }
}

</mosaic_0001>

<bundles_post_ra>
// kernel: tpu_custom_call.1
= control target key start
LH: loop header
LB: loop body
LE: loop exit
PB: predicated region body
PF: predicated region fallthrough
CT: control target
= control target key end

     0   :  { %s466_s12 = smov 0   ;;  %s505_s0 = inlined_call_operand.vmem [shape: f32[128,8], index: 0, kind: input, shape index: {}]   ;;  %s506_s1 = inlined_call_operand.vmem [shape: f32[8,32], index: 1, kind: input, shape index: {}]   ;;  %s507_s2 = inlined_call_operand.vmem [shape: f32[1,32], index: 2, kind: input, shape index: {}]   ;;  %s508_s3 = inlined_call_operand.vmem [shape: f32[128,32], index: 3, kind: output, shape index: {}]  }
   0x1 LB: > { %s385_s13 = sadd.s32 4294967295, %s444_s12   ;;  %p389_p0 = scmp.ge.s32.totalorder %s444_s12, 1  ;;  %s444_s12 = sphi %s466_s12, %s13_s12  }
   0x2   : > { %p138_p1 = scmp.lt.s32.totalorder %s444_s12, 3 }
   0x4   : > { %p139_p2 = pnand %p389_p0, %p138_p1 }
   0x5   : > { %v182_v0 = vld [vmem:[%s506_s1] sm:$0xff] (!%p139_p2)  ;;  %s390_s16 = sshll.u32 (!%p139_p2), %s385_s13, 3  ;;  %vm190_vm0 = vcmask (!%p139_p2), 64512   ;;  %vm320_vm1 = vcmask (!%p139_p2), 261120  }
   0x6   : > { %142 = sbr.rel (%p139_p2) target bundleno = 239 (0xef), region = 32  ;;  %414 = vmatprep.subr.mxu0 (!%p139_p2), %v182_v0  ;;  %428 = vmatprep.subr.mxu1 (!%p139_p2), %v182_v0  ;;  %p163_p3 = scmp.lt.s32.totalorder (!%p139_p2), %s390_s16, 15  ;;  %v394_v9 = vld [vmem:[%s507_s2] ss:$0 sm:$0xff] (!%p139_p2) }
   0x7   : > { %415 = vmatpush3.msra.mxu0 (!%p139_p2), %v182_v0  ;;  %429 = vmatpush3.msra.mxu1 (!%p139_p2), %v182_v0 }
   0xd   : > { %s510_s16 = smov (!%p163_p3, %s390_s16), 15 }
   0xe   : > { %s391_s17 = sshll.u32 %s510_s16, 3 }
   0xf   : > { %s166_s20 = scalar_lea.vmem %s505_s0, %s391_s17  ;;  %s172_s25 = scalar_lea.vmem %s508_s3, %s391_s17 }
  0x10   : > { %v174_v1 = vld [vmem:[%s166_s20] sm:$0xff]  ;;  %v175_v3 = vld [vmem:[%s166_s20 + $0x8] sm:$0xff]  ;;  %v176_v5 = vld [vmem:[%s166_s20 + $0x10] sm:$0xff] }
  0x11   : > { %v178_v2 = vld [vmem:[%s166_s20 + $0x20] sm:$0xff]  ;;  %416 = vmatprep.mubr.msk.f32.mxu0 %vm190_vm0, %v174_v1  ;;  %v179_v4 = vld [vmem:[%s166_s20 + $0x28] sm:$0xff]  ;;  %v180_v6 = vld [vmem:[%s166_s20 + $0x30] sm:$0xff] }
  0x12   : > { %422 = vmatprep.mubr.msk.f32.mxu1 %vm190_vm0, %v178_v2  ;;  %417 = vmatmul.mubr.msk.f32.vlgmr.msra.gmra.mrb[0].mxu0 %vm190_vm0, %v175_v3  ;;  %v177_v7 = vld [vmem:[%s166_s20 + $0x18] sm:$0xff] }
  0x13   : > { %423 = vmatmul.mubr.msk.f32.vlgmr.msra.gmra.mrb[0].mxu1 %vm190_vm0, %v179_v4  ;;  %419 = vmatprep.mubr.msk.f32.mxu0 %vm190_vm0, %v176_v5  ;;  %v181_v8 = vld [vmem:[%s166_s20 + $0x38] sm:$0xff] }
  0x14   : > { %425 = vmatprep.mubr.msk.f32.mxu1 %vm190_vm0, %v180_v6 }
  0x16   : > { %420 = vmatmul.mubr.msk.f32.gmra.mrb[2].mxu0 %vm190_vm0, %v177_v7 }
  0x17   : > { %426 = vmatmul.mubr.msk.f32.gmra.mrb[2].mxu1 %vm190_vm0, %v181_v8 }
  0xe5   : > { %v418_v10 = vpop.f32.mrb[0].mxu0 }
  0xe6   : > { %v424_v11 = vpop.f32.mrb[0].mxu1  ;;  %v287_v12 = vadd.f32 %v418_v10, %v394_v9  ;;  %v281_v14 = vpop.f32.mrb[1].mxu0 }
  0xe7   : > { %v307_v13 = vadd.f32 %v424_v11, %v394_v9  ;;  %v301_v15 = vpop.f32.mrb[1].mxu1  ;;  %v282_v16 = vadd.f32 %v394_v9, %v281_v14 }
  0xe8   : > { %v302_v17 = vadd.f32 %v394_v9, %v301_v15  ;;  %322 = vst.msk [vmem:[%s172_s25 + $0x8] sm:$0xff] %vm320_vm1, %v287_v12 }
  0xe9   : > { %326 = vst.msk [vmem:[%s172_s25 + $0x28] sm:$0xff] %vm320_vm1, %v307_v13  ;;  %321 = vst.msk [vmem:[%s172_s25] sm:$0xff] %vm320_vm1, %v282_v16  ;;  %v421_v18 = vpop.f32.mrb[2].mxu0 }
  0xea   : > { %325 = vst.msk [vmem:[%s172_s25 + $0x20] sm:$0xff] %vm320_vm1, %v302_v17  ;;  %v427_v19 = vpop.f32.mrb[2].mxu1  ;;  %v297_v20 = vadd.f32 %v421_v18, %v394_v9  ;;  %v291_v22 = vpop.f32.mrb[3].mxu0 }
  0xeb   : > { %v317_v21 = vadd.f32 %v427_v19, %v394_v9  ;;  %v311_v23 = vpop.f32.mrb[3].mxu1  ;;  %v292_v24 = vadd.f32 %v394_v9, %v291_v22 }
  0xec   : > { %v312_v25 = vadd.f32 %v394_v9, %v311_v23  ;;  %324 = vst.msk [vmem:[%s172_s25 + $0x18] sm:$0xff] %vm320_vm1, %v297_v20 }
  0xed   : > { %328 = vst.msk [vmem:[%s172_s25 + $0x38] sm:$0xff] %vm320_vm1, %v317_v21  ;;  %323 = vst.msk [vmem:[%s172_s25 + $0x10] sm:$0xff] %vm320_vm1, %v292_v24 }
  0xee   : > { %327 = vst.msk [vmem:[%s172_s25 + $0x30] sm:$0xff] %vm320_vm1, %v312_v25 }
  0xef PF: > { %s13_s12 = sadd.s32 1, %s444_s12  }
  0xf0   : > { %p10_p4 = scmp.ge.s32.totalorder %s13_s12, 4  }
  0xf2   :  { %12 = sbr.rel (!%p10_p4) target bundleno = 1 (0x1), region = 62 }

</bundles_post_ra>
